<compile_context>
chip_gen: v5e
topology: v5e:2x2
jax: 0.10.0
libtpu: 0.0.40
codegen_flags: <defaults>
</compile_context>

<pallas_src>
import math

import jax
import jax.numpy as jnp
from jax import lax
from jax.experimental import pallas as pl
from jax.experimental.pallas import tpu as pltpu


def _downsample_kernel(x_ref, w_ref, b_ref, o_ref):
    # x_ref : (tr, p, Wo, K1)  activation tile (all p kernel rows, contiguous)
    # w_ref : (p, K1, Npad)    bf16 weight, resident (constant index map)
    # b_ref : (1, Npad)        f32 bias (lane-padded)
    # o_ref : (tr*Wo, Npad)    output rows for this tile
    tr, p, wo, k1 = x_ref.shape
    rows = tr * wo

    xall = x_ref[...]                       # one contiguous VMEM load
    # Unrolled kh chain of MXU dots; partial sums stay in vregs.
    xb = xall[:, 0].reshape(rows, k1).astype(jnp.bfloat16)
    acc = jnp.dot(xb, w_ref[0], preferred_element_type=jnp.float32)
    for kh in range(1, p):
        xb = xall[:, kh].reshape(rows, k1).astype(jnp.bfloat16)
        acc = acc + jnp.dot(xb, w_ref[kh], preferred_element_type=jnp.float32)

    o_ref[...] = (acc + b_ref[...]).astype(o_ref.dtype)


def _tpu_vmem_plan():
    """Generation-aware (sizing_budget, vmem_limit_bytes, multi_tensorcore)."""
    vmem_cap = None
    try:
        vmem_cap = int(pltpu.get_tpu_info().vmem_capacity_bytes)
    except Exception:
        vmem_cap = None
    if vmem_cap is None:
        vmem_cap = 64 * 1024 * 1024                 # conservative fallback (v7x/TC)
    if vmem_cap >= 96 * 1024 * 1024:                # v5e / v6e class: 128 MiB, 1 TC
        return 48 * 1024 * 1024, 96 * 1024 * 1024, False
    # v7x class: 64 MiB per TensorCore, 2 TCs per chip share the grid
    return 32 * 1024 * 1024, 48 * 1024 * 1024, True


def downsample(x, weight, bias, patch_size, *, target_rows=4096):
    """Pallas implementation of Downsample.forward.

    x:      (B, H, W, C_in)      NHWC (layout the PyTorch module receives)
    weight: (C_out, C_in, p, p)  PyTorch Conv2d OIHW layout
    bias:   (C_out,)
    returns (B, H//p, W//p, C_out)
    """
    B, H, W, Cin = x.shape
    Cout = weight.shape[0]
    p = patch_size
    Ho, Wo = H // p, W // p
    if (H % p) or (W % p):                  # strided conv drops the remainder
        x = x[:, :Ho * p, :Wo * p, :]

    R = B * Ho                              # (b, ho) row-pairs
    K1 = p * Cin                            # per-kh contraction length (kw, cin)
    M = R * Wo                              # GEMM rows == number of output patches

    LANE = 128
    Npad = ((Cout + LANE - 1) // LANE) * LANE

    # Contiguous reshape only (no copy): (B, H, W, Cin) -> (R, p, Wo, K1)
    x5 = x.reshape(R, p, Wo, K1)

    # Conv weight (Cout, Cin, kh, kw) -> (kh, (kw, cin), Cout); lane-pad Cout.
    wf = weight.transpose(2, 3, 1, 0).reshape(p, K1, Cout)
    if Npad != Cout:
        wf = jnp.pad(wf, ((0, 0), (0, 0), (0, Npad - Cout)))
        bf = jnp.pad(bias, (0, Npad - Cout)).reshape(1, Npad)
    else:
        bf = bias.reshape(1, Npad)
    wf = wf.astype(jnp.bfloat16)            # bf16 MXU operands, f32 accumulation
    bf = bf.astype(jnp.float32)

    budget, vmem_limit, multi_tc = _tpu_vmem_plan()

    # ---- row-tile (tr) selection --------------------------------------------
    sub = 8 // math.gcd(Wo, 8)              # keep tr*Wo a multiple of 8 sublanes
    tr = max(1, target_rows // max(Wo, 1))
    tr = min(tr, R)
    if multi_tc and R >= 2:
        tr = min(tr, pl.cdiv(R, 2))         # keep work for both v7x TensorCores
    tr = max(sub, (tr // sub) * sub)

    x_isz = jnp.dtype(x5.dtype).itemsize
    o_isz = jnp.dtype(x.dtype).itemsize

    def _vmem_bytes(t):
        rows = t * Wo
        return (2 * t * p * Wo * K1 * x_isz  # double-buffered activation tile
                + 2 * p * K1 * Npad * 2      # bf16 weight (resident, counted 2x)
                + 2 * Npad * 4               # bias
                + 2 * rows * Npad * o_isz)   # double-buffered output tile

    while tr > sub and _vmem_bytes(tr) > budget:
        tr = max(sub, ((tr // 2) // sub) * sub)

    if multi_tc and R > tr:
        # Even number of parallel steps so neither TensorCore idles on a tail.
        while pl.cdiv(R, tr) % 2 == 1 and tr > sub:
            tr -= sub

    grid = (pl.cdiv(R, tr),)                # ragged tail handled by partial blocks

    out = pl.pallas_call(
        _downsample_kernel,
        out_shape=jax.ShapeDtypeStruct((M, Npad), x.dtype),
        grid_spec=pltpu.PrefetchScalarGridSpec(
            num_scalar_prefetch=0,
            grid=grid,
            in_specs=[
                pl.BlockSpec((tr, p, Wo, K1), lambda i: (i, 0, 0, 0)),
                pl.BlockSpec((p, K1, Npad), lambda i: (0, 0, 0)),   # resident weight
                pl.BlockSpec((1, Npad), lambda i: (0, 0)),          # resident bias
            ],
            out_specs=pl.BlockSpec((tr * Wo, Npad), lambda i: (i, 0)),
        ),
        compiler_params=pltpu.CompilerParams(
            dimension_semantics=("parallel",),
            vmem_limit_bytes=vmem_limit,
        ),
    )(x5, wf, bf)

    if Npad != Cout:
        # NOTE: this slice is an extra HBM pass in XLA; if the consumer can take
        # the lane-padded layout, skip it or fuse it into the consumer.
        out = out[:, :Cout]
    return out.reshape(B, Ho, Wo, Cout)


def _torch_like_conv_init(key, Cout, Cin, P):
    kw, kb = jax.random.split(key)
    fan_in = Cin * P * P
    bound = 1.0 / (fan_in ** 0.5)
    weight = jax.random.uniform(kw, (Cout, Cin, P, P), jnp.float32,
                                minval=-bound, maxval=bound)
    bias = jax.random.uniform(kb, (Cout,), jnp.float32,
                              minval=-bound, maxval=bound)
    return weight, bias


def _reference(x, weight, bias, P):
    # permute -> Conv2d(stride=kernel=P) -> permute, expressed as an XLA conv.
    return lax.conv_general_dilated(
        x, weight, window_strides=(P, P), padding="VALID",
        dimension_numbers=("NHWC", "OIHW", "NHWC")) + bias


if __name__ == "__main__":
    key = jax.random.PRNGKey(0)
    k1, k2, k3, k4 = jax.random.split(key, 4)

    # --- Case 1: shapes consistent with the module (in=4, out=8, patch=2) ----
    B, H, W, Cin, Cout, P = 2, 16, 16, 4, 8, 2
    x = jax.random.normal(k1, (B, H, W, Cin), dtype=jnp.float32)
    weight, bias = _torch_like_conv_init(k2, Cout, Cin, P)

    down = jax.jit(lambda a, w, b: downsample(a, w, b, P))
    out = jax.block_until_ready(down(x, weight, bias))
    ref = _reference(x, weight, bias, P)
    assert out.shape == (B, H // P, W // P, Cout)
    err1 = float(jnp.max(jnp.abs(out - ref)))
    # bf16 MXU operands (f32 accumulation) -> loosened tolerance vs f32 reference.
    assert jnp.allclose(out, ref, atol=3e-2, rtol=3e-2), f"max |err| = {err1}"

    # --- Case 2: ragged tiles (R % tr != 0), cropped H/W, Cout not lane-aligned
    B2, H2, W2, Cin2, Cout2, P2 = 3, 11, 13, 4, 6, 2
    x2 = jax.random.normal(k3, (B2, H2, W2, Cin2), dtype=jnp.float32)
    weight2, bias2 = _torch_like_conv_init(k4, Cout2, Cin2, P2)

    down2 = jax.jit(lambda a, w, b: downsample(a, w, b, P2, target_rows=32))
    out2 = jax.block_until_ready(down2(x2, weight2, bias2))
    ref2 = _reference(x2, weight2, bias2, P2)
    assert out2.shape == (B2, H2 // P2, W2 // P2, Cout2)
    err2 = float(jnp.max(jnp.abs(out2 - ref2)))
    assert jnp.allclose(out2, ref2, atol=3e-2, rtol=3e-2), f"max |err| = {err2}"

    print("KERNEL_OK")
</pallas_src>

<mosaic_0001>
module attributes {stable_mosaic.version = 11 : i64} {
  func.func @_downsample_kernel(%arg0: i32, %arg1: memref<8x2x8x8xf32, #tpu.memory_space<vmem>>, %arg2: memref<2x8x128xbf16, #tpu.memory_space<vmem>>, %arg3: memref<1x128xf32, #tpu.memory_space<vmem>>, %arg4: memref<64x128xf32, #tpu.memory_space<vmem>>) attributes {dimension_semantics = [#tpu.dimension_semantics<parallel>], iteration_bounds = array<i64: 2>, scalar_prefetch = 0 : i64, scratch_operands = 0 : i64, tpu.core_type = #tpu.core_type<tc>, window_params = [{transform_indices = @transform_0, window_bounds = array<i64: 8, 2, 8, 8>}, {pipeline_mode = #tpu.pipeline_mode<synchronous>, transform_indices = @transform_1, window_bounds = array<i64: 2, 8, 128>}, {pipeline_mode = #tpu.pipeline_mode<synchronous>, transform_indices = @transform_2, window_bounds = array<i64: 1, 128>}, {transform_indices = @transform_3, window_bounds = array<i64: 64, 128>}]} {
    %c0 = arith.constant 0 : index
    %c0_0 = arith.constant 0 : index
    %c0_1 = arith.constant 0 : index
    %c0_2 = arith.constant 0 : index
    %0 = vector.load %arg1[%c0, %c0_0, %c0_1, %c0_2] : memref<8x2x8x8xf32, #tpu.memory_space<vmem>>, vector<8x2x8x8xf32>
    %1 = vector.extract_strided_slice %0 {offsets = [0, 0, 0, 0], sizes = [8, 1, 8, 8], strides = [1, 1, 1, 1]} : vector<8x2x8x8xf32> to vector<8x1x8x8xf32>
    %2 = vector.shape_cast %1 : vector<8x1x8x8xf32> to vector<8x8x8xf32>
    %3 = vector.shape_cast %2 : vector<8x8x8xf32> to vector<64x8xf32>
    %4 = arith.truncf %3 : vector<64x8xf32> to vector<64x8xbf16>
    %c0_3 = arith.constant 0 : index
    %c0_4 = arith.constant 0 : index
    %c0_5 = arith.constant 0 : index
    %5 = vector.load %arg2[%c0_3, %c0_4, %c0_5] : memref<2x8x128xbf16, #tpu.memory_space<vmem>>, vector<1x8x128xbf16>
    %6 = vector.shape_cast %5 : vector<1x8x128xbf16> to vector<8x128xbf16>
    %cst = arith.constant dense<0.000000e+00> : vector<64x128xf32>
    %7 = tpu.matmul %4, %6, %cst {dimension_numbers = #tpu.dot_dimension_numbers<[1], [0], [0], [1], [0, 0, 1, 1], [], []>} : vector<64x8xbf16>, vector<8x128xbf16>, vector<64x128xf32> -> vector<64x128xf32>
    %8 = vector.extract_strided_slice %0 {offsets = [0, 1, 0, 0], sizes = [8, 1, 8, 8], strides = [1, 1, 1, 1]} : vector<8x2x8x8xf32> to vector<8x1x8x8xf32>
    %9 = vector.shape_cast %8 : vector<8x1x8x8xf32> to vector<8x8x8xf32>
    %10 = vector.shape_cast %9 : vector<8x8x8xf32> to vector<64x8xf32>
    %11 = arith.truncf %10 : vector<64x8xf32> to vector<64x8xbf16>
    %c1 = arith.constant 1 : index
    %c0_6 = arith.constant 0 : index
    %c0_7 = arith.constant 0 : index
    %12 = vector.load %arg2[%c1, %c0_6, %c0_7] : memref<2x8x128xbf16, #tpu.memory_space<vmem>>, vector<1x8x128xbf16>
    %13 = vector.shape_cast %12 : vector<1x8x128xbf16> to vector<8x128xbf16>
    %cst_8 = arith.constant dense<0.000000e+00> : vector<64x128xf32>
    %14 = tpu.matmul %11, %13, %cst_8 {dimension_numbers = #tpu.dot_dimension_numbers<[1], [0], [0], [1], [0, 0, 1, 1], [], []>} : vector<64x8xbf16>, vector<8x128xbf16>, vector<64x128xf32> -> vector<64x128xf32>
    %15 = arith.addf %7, %14 : vector<64x128xf32>
    %c0_9 = arith.constant 0 : index
    %c0_10 = arith.constant 0 : index
    %16 = vector.load %arg3[%c0_9, %c0_10] : memref<1x128xf32, #tpu.memory_space<vmem>>, vector<1x128xf32>
    %17 = vector.broadcast %16 : vector<1x128xf32> to vector<64x128xf32>
    %18 = arith.addf %15, %17 : vector<64x128xf32>
    %c0_11 = arith.constant 0 : index
    %c0_12 = arith.constant 0 : index
    %19 = vector.load %arg4[%c0_11, %c0_12] : memref<64x128xf32, #tpu.memory_space<vmem>>, vector<64x128xf32>
    tpu.vector_store %arg4[%c0_11, %c0_12], %18 {strides = array<i32>} : memref<64x128xf32, #tpu.memory_space<vmem>>, vector<64x128xf32>,
    return
  }
  func.func @transform_0(%arg0: i32) -> (i32, i32, i32, i32) {
    %c0_i32 = arith.constant 0 : i32
    %c0_i32_0 = arith.constant 0 : i32
    %c0_i32_1 = arith.constant 0 : i32
    %c0_i32_2 = arith.constant 0 : i32
    return %arg0, %c0_i32, %c0_i32_0, %c0_i32_1 : i32, i32, i32, i32
  }
  func.func @transform_1(%arg0: i32) -> (i32, i32, i32) {
    %c0_i32 = arith.constant 0 : i32
    %c0_i32_0 = arith.constant 0 : i32
    %c0_i32_1 = arith.constant 0 : i32
    %c0_i32_2 = arith.constant 0 : i32
    return %c0_i32, %c0_i32_0, %c0_i32_1 : i32, i32, i32
  }
  func.func @transform_2(%arg0: i32) -> (i32, i32) {
    %c0_i32 = arith.constant 0 : i32
    %c0_i32_0 = arith.constant 0 : i32
    %c0_i32_1 = arith.constant 0 : i32
    return %c0_i32, %c0_i32_0 : i32, i32
  }
  func.func @transform_3(%arg0: i32) -> (i32, i32) {
    %c0_i32 = arith.constant 0 : i32
    %c0_i32_0 = arith.constant 0 : i32
    return %arg0, %c0_i32 : i32, i32
  }
}

</mosaic_0001>

<bundles_post_ra>
// kernel: _lambda_.1
= control target key start
LH: loop header
LB: loop body
LE: loop exit
PB: predicated region body
PF: predicated region fallthrough
CT: control target
= control target key end

     0   :  { %8 = vsyncpa [#allocation3], 0  ;;  %s661_s0 = inlined_call_operand.vmem [shape: f32[16,2,8,8], index: 0, kind: input, shape index: {}]   ;;  %s662_s1 = inlined_call_operand.vmem [shape: bf16[2,8,128], index: 1, kind: input, shape index: {}]   ;;  %s663_s2 = inlined_call_operand.vmem [shape: f32[1,128], index: 2, kind: input, shape index: {}]   ;;  %s664_s3 = inlined_call_operand.hbm [shape: f32[128,128], index: 3, kind: output, shape index: {}]  }
   0x1   :  { %10 = vsyncpa [#allocation3 + $0x1], 0  ;;  %s545_s12 = smov 0   ;;  %s547_s13 = smov 0  }
   0x2   :  { %s549_s14 = smov 0   ;;  %s551_s15 = smov 0  }
   0x3 LB: > { %s566_s16 = sadd.s32 4294967295, %s521_s15   ;;  %s391_s17 = sadd.s32 4294967294, %s521_s15   ;;  %s521_s15 = sphi %s551_s15, %s670_s15   ;;  %s517_s14 = sphi %s549_s14, %s669_s14   ;;  %s513_s13 = sphi %s547_s13, %s668_s13   ;;  %s509_s12 = sphi %s545_s12, %s667_s12  }
   0x4   : > { %s570_s18 = sadd.s32 1, %s521_s15   ;;  %s91_s19 = sadd.s32 1, %s517_s14 }
   0x5   : > { %s88_s20 = ssub.s32 %s521_s15, %s570_s18  ;;  %p101_p0 = scmp.ne.s32.totalorder %s517_s14, %s513_s13 }
   0x6   : > { %p89_p1 = scmp.eq.s32.totalorder %s88_s20, 0  ;;  %p102_p2 = scmp.eq.s32.totalorder %s566_s16, 1 }
   0x7   : > { %p107_p3 = scmp.ne.s32.totalorder %s513_s13, %s509_s12  ;;  %p108_p4 = scmp.eq.s32.totalorder %s391_s17, 1 }
   0x8   : > { %s581_s21 = scalar_select %p89_p1, %s517_s14, %s91_s19  }
   0x9   : > { %p583_p5 = por %p102_p2, %p101_p0  ;;  %p587_p6 = por %p108_p4, %p107_p3 }
   0xa   : > { %p394_p7 = scmp.ge.s32.totalorder %s521_s15, 1  ;;  %p142_p8 = scmp.lt.s32.totalorder %s521_s15, 3 }
   0xc   : > { %p143_p9 = pnand %p394_p7, %p142_p8 }
   0xd   : > { %s396_s28 = sshll.u32 (!%p143_p9), %s566_s16, 3  ;;  %s164_s6 = sand.u32 (!%p143_p9), 1, %s513_s13  }
   0xe   : > { %146 = sbr.rel (%p143_p9) target bundleno = 191 (0xbf), region = 32  ;;  %p168_p10 = scmp.lt.s32.totalorder (!%p143_p9), %s396_s28, 15 }
   0xf   : > { %s395_s7 = sshll.u32 (!%p143_p9), %s164_s6, 6  ;;  %s414_s11 = sshll.u32 (!%p143_p9), %s566_s16, 6 }
  0x10   : > { %s617_s10 = scalar_lea.vmem (!%p143_p9), [#allocation2], %s395_s7  ;;  %s325_s20 = scalar_lea.hbm (!%p143_p9), %s664_s3, %s414_s11 }
  0x11   : > { %s326_s24 = sshll.u32 (!%p143_p9), %s617_s10, 4  ;;  %s328_s25 = sshll.u32 (!%p143_p9), %s325_s20, 4  ;;  %s327_s24 = int_to_ptr.vmem [resolvable:$true] %s326_s24  ;;  %s329_s25 = int_to_ptr.hbm [resolvable:$true] %s328_s25 }
  0x12   : > { %s314_s16 = scalar_lea.sflag (!%p143_p9), [#allocation3], %s164_s6  ;;  %s473_s26 = sshra.s32 (!%p143_p9), %s329_s25, 4  ;;  %s474_s26 = int_to_ptr.hbm [resolvable:$true] %s473_s26 }
  0x13   : > { %v399_v0 = vld [vmem:[%s662_s1 + $0x4] sm:$0xf]  ;;  %vm216_vm0 = vcmask 1043456   ;;  %v196_v1 = vld [vmem:[%s662_s1] sm:$0xf]  ;;  %s672_s28 = smov (!%p168_p10, %s396_s28), 15  ;;  %p480_p0 = scmp.lt.s32.totalorder %s474_s26, %s664_s3 }
  0x14   : > { %v218_v2 = vsel %vm216_vm0, %v399_v0, 0  ;;  %v262_v3 = vsel %vm216_vm0, %v196_v1, 0  ;;  %s413_s29 = sshll.u32 %s672_s28, 4  ;;  %vm203_vm1 = vcmask 64512   ;;  %v458_v29 = vld [vmem:[%s663_s2] ss:$0 sm:$0xff] }
  0x15   : > { %227 = vmatpush.bf16.msra.mxu0 %v218_v2  ;;  %415 = vmatpush.bf16.msra.mxu2 %v218_v2  ;;  %s172_s5 = scalar_lea.vmem %s661_s0, %s413_s29  ;;  %s475_s27 = scalar_lea.hbm %s474_s26, 64 }
  0x16   : > { %271 = vmatpush.bf16.msra.mxu1 %v262_v3  ;;  %416 = vmatpush.bf16.msra.mxu3 %v262_v3  ;;  %v177_v4 = vld [vmem:[%s172_s5 + $0x8] sm:$0xff]  ;;  %v179_v5 = vld [vmem:[%s172_s5 + $0x18] sm:$0xff]  ;;  %v176_v9 = vld [vmem:[%s172_s5] sm:$0xff]  ;;  %p476_p11 = scmp.ne.s32.totalorder %s474_s26, %s475_s27  ;;  %s479_s30 = scalar_lea.hbm %s664_s3, 128 }
  0x17   : > { %v185_v6 = vld [vmem:[%s172_s5 + $0x48] sm:$0xff]  ;;  %v197_v7 = vpack.c.bf16 %v179_v5, %v177_v4  ;;  %v187_v8 = vld [vmem:[%s172_s5 + $0x58] sm:$0xff]  ;;  %v178_v10 = vld [vmem:[%s172_s5 + $0x10] sm:$0xff]  ;;  %p481_p1 = scmp.lt.s32.totalorder %s479_s30, %s475_s27 }
  0x18   : > { %v199_v11 = vpack.c.bf16 %v187_v8, %v185_v6  ;;  %v192_v12 = vpack.c.bf16 %v178_v10, %v176_v9  ;;  %v184_v13 = vld [vmem:[%s172_s5 + $0x40] sm:$0xff]  ;;  %v186_v14 = vld [vmem:[%s172_s5 + $0x50] sm:$0xff]  ;;  %v181_v16 = vld [vmem:[%s172_s5 + $0x28] sm:$0xff]  ;;  %p477_p12 = pnand %p476_p11, %p583_p5 }
  0x19   : > { %400 = vmatmul.msk.bf16.vlgmr.msra.gmra.mxu0 %vm203_vm1, %v197_v7  ;;  %v194_v15 = vpack.c.bf16 %v186_v14, %v184_v13  ;;  %v183_v17 = vld [vmem:[%s172_s5 + $0x38] sm:$0xff]  ;;  %v189_v18 = vld [vmem:[%s172_s5 + $0x68] sm:$0xff]  ;;  %v180_v20 = vld [vmem:[%s172_s5 + $0x20] sm:$0xff]  ;;  %p482_p2 = por %p481_p1, %p480_p0 }
  0x1a   : > { %402 = vmatmul.msk.bf16.vlgmr.msra.gmra.mxu2 %vm203_vm1, %v199_v11  ;;  %404 = vmatmul.msk.bf16.vlgmr.msra.gmra.mxu1 %vm203_vm1, %v192_v12  ;;  %v191_v19 = vld [vmem:[%s172_s5 + $0x78] sm:$0xff]  ;;  %v182_v21 = vld [vmem:[%s172_s5 + $0x30] sm:$0xff]  ;;  %v188_v22 = vld [vmem:[%s172_s5 + $0x60] sm:$0xff]  ;;  %v198_v24 = vpack.c.bf16 %v183_v17, %v181_v16  ;;  %p478_p13 = pneg %p477_p12 }
  0x1b   : > { %406 = vmatmul.msk.bf16.vlgmr.msra.gmra.mxu3 %vm203_vm1, %v194_v15  ;;  %v190_v23 = vld [vmem:[%s172_s5 + $0x70] sm:$0xff]  ;;  %v200_v25 = vpack.c.bf16 %v191_v19, %v189_v18  ;;  %v193_v26 = vpack.c.bf16 %v182_v21, %v180_v20 }
  0x1c   : > { %v195_v27 = vpack.c.bf16 %v190_v23, %v188_v22  ;;  %p483_p3 = pnand %p482_p2, %p478_p13 }
  0x29   : > { %401 = vmatmul.msk.bf16.gmra.mxu0 %vm203_vm1, %v198_v24 }
  0x2a   : > { %403 = vmatmul.msk.bf16.gmra.mxu2 %vm203_vm1, %v200_v25  ;;  %405 = vmatmul.msk.bf16.gmra.mxu1 %vm203_vm1, %v193_v26 }
  0x2b   : > { %407 = vmatmul.msk.bf16.gmra.mxu3 %vm203_vm1, %v195_v27 }
  0x96   : > { %v229_v28 = vpop.f32.mrf.mxu0 }
  0x97   : > { %v273_v30 = vpop.f32.mrf.mxu1 }
  0x98   : > { %v274_v31 = vadd.f32 %v273_v30, %v229_v28 }
  0x9a   : > { %v297_v32 = vadd.f32 %v458_v29, %v274_v31 }
  0x9c   : > { %305 = vst [vmem:[%s617_s10] sm:$0xff] %v297_v32 }
  0x9d   : > { %v239_v33 = vpop.f32.mrf.mxu2 }
  0x9e   : > { %v283_v34 = vpop.f32.mrf.mxu3  ;;  %v231_v35 = vpop.f32.mrf.mxu0 }
  0x9f   : > { %v284_v36 = vadd.f32 %v283_v34, %v239_v33  ;;  %v275_v37 = vpop.f32.mrf.mxu1 }
  0xa0   : > { %v276_v38 = vadd.f32 %v275_v37, %v231_v35 }
  0xa1   : > { %v301_v39 = vadd.f32 %v458_v29, %v284_v36 }
  0xa2   : > { %v298_v40 = vadd.f32 %v458_v29, %v276_v38 }
  0xa3   : > { %309 = vst [vmem:[%s617_s10 + $0x20] sm:$0xff] %v301_v39 }
  0xa4   : > { %306 = vst [vmem:[%s617_s10 + $0x8] sm:$0xff] %v298_v40 }
  0xa5   : > { %v241_v41 = vpop.f32.mrf.mxu2 }
  0xa6   : > { %v285_v42 = vpop.f32.mrf.mxu3  ;;  %v234_v43 = vpop.f32.mrf.mxu0 }
  0xa7   : > { %v286_v44 = vadd.f32 %v285_v42, %v241_v41  ;;  %v278_v45 = vpop.f32.mrf.mxu1 }
  0xa8   : > { %v279_v46 = vadd.f32 %v278_v45, %v234_v43 }
  0xa9   : > { %v302_v47 = vadd.f32 %v458_v29, %v286_v44 }
  0xaa   : > { %v299_v48 = vadd.f32 %v458_v29, %v279_v46 }
  0xab   : > { %310 = vst [vmem:[%s617_s10 + $0x28] sm:$0xff] %v302_v47 }
  0xac   : > { %307 = vst [vmem:[%s617_s10 + $0x10] sm:$0xff] %v299_v48 }
  0xad   : > { %v244_v49 = vpop.f32.mrf.mxu2 }
  0xae   : > { %v288_v50 = vpop.f32.mrf.mxu3  ;;  %v236_v51 = vpop.f32.mrf.mxu0 }
  0xaf   : > { %v289_v52 = vadd.f32 %v288_v50, %v244_v49  ;;  %v280_v53 = vpop.f32.mrf.mxu1 }
  0xb0   : > { %v281_v54 = vadd.f32 %v280_v53, %v236_v51 }
  0xb1   : > { %v303_v55 = vadd.f32 %v458_v29, %v289_v52 }
  0xb2   : > { %v300_v56 = vadd.f32 %v458_v29, %v281_v54 }
  0xb3   : > { %311 = vst [vmem:[%s617_s10 + $0x30] sm:$0xff] %v303_v55 }
  0xb4   : > { %308 = vst [vmem:[%s617_s10 + $0x18] sm:$0xff] %v300_v56 }
  0xb5   : > { %v246_v57 = vpop.f32.mrf.mxu2 }
  0xb6   : > { %v290_v58 = vpop.f32.mrf.mxu3 }
  0xb7   : > { %v291_v59 = vadd.f32 %v290_v58, %v246_v57 }
  0xb9   : > { %v304_v60 = vadd.f32 %v458_v29, %v291_v59 }
  0xbb   : > { %312 = vst [vmem:[%s617_s10 + $0x38] sm:$0xff] %v304_v60 }
  0xbc   : > { %486 = shalt.err (!%p483_p3)
}
  0xbd   : > { %s523_s6 = smov 128   ;;  %s524_s7 = smov 8  }
  0xbe   : > { %417 = dma.vmem_to_hbm [thread:$0]  (%p583_p5), %s327_s24, 1024, %s329_s25, %s314_s16, %s523_s6, %s523_s6, %s524_s7  }
  0xbf PF: > { %p423_p4 = scmp.ge.s32.totalorder %s521_s15, 2  ;;  %s343_s8 = sand.u32 1, %s509_s12  }
  0xc0   : > { %s344_s9 = scalar_lea.sflag [#allocation3], %s343_s8 }
  0xc1   : > { %p420_p7 = pnand %p423_p4, %p587_p6 }
  0xc3   : > { %p421_p8 = pneg %p420_p7 }
  0xc5   : > { %504 = dma.done.wait (%p421_p8), %s344_s9, 1024  }
  0xc6   : > { %506 = vsyncadd (%p421_p8), %s344_s9, 4294966272  ;;  %p13_p9 = scmp.ge.s32.totalorder %s570_s18, 4   ;;  %s667_s12 = smov %s513_s13 }
  0xc7   : > { %s668_s13 = smov %s517_s14  ;;  %s669_s14 = smov %s581_s21 }
  0xc8   : > { %s670_s15 = smov %s570_s18  ;;  %15 = sbr.rel (!%p13_p9) target bundleno = 3 (0x3), region = 68 }
  0xcd   :  { %350 = vsyncpa [#allocation3], 1 }
  0xce   :  { %352 = vsyncpa [#allocation3 + $0x1], 1 }

</bundles_post_ra>
